<compile_context>
chip_gen: v6e
topology: v6e:2x2x1
jax: 0.10.0
libtpu: 0.0.40
codegen_flags: <defaults>
</compile_context>

<pallas_src>
import jax
import jax.numpy as jnp
import numpy as np
from jax import lax
from jax.experimental import pallas as pl
from jax.experimental.pallas import tpu as pltpu


def network_old_kernel(x_ref, w_in_ref, b_in_ref, w_head_ref, b_head_ref, out_ref):
    # Fused conv1 + concat(image[:, cmd]) + fc1 (+ReLU): one lane-major matmul.
    hid = jnp.dot(x_ref[...], w_in_ref[...], preferred_element_type=jnp.float32)
    hid = jnp.maximum(hid + b_in_ref[...], 0.0)                       # (1, h2)

    # Fused heads: [fc_a | fc_v] in a single matmul -> (1, A+1), lane-major.
    head = jnp.dot(hid, w_head_ref[...], preferred_element_type=jnp.float32)
    head = head + b_head_ref[...]                                     # (1, A+1)

    num_actions = out_ref.shape[1] - 1
    lane = lax.broadcasted_iota(jnp.int32, head.shape, 1)
    is_logit = lane < num_actions

    # Softmax over the action lanes; the value lane passes through untouched.
    masked = jnp.where(is_logit, head, -1e30)
    m = jnp.max(masked, axis=1, keepdims=True)
    e = jnp.exp(masked - m)
    probs = e / jnp.sum(e, axis=1, keepdims=True)
    out_ref[...] = jnp.where(is_logit, probs, head)                   # [probs..., value]


def prepare_network_old_params(params):
    """One-time parameter preprocessing (hoisted out of the per-call path)."""
    wconv, bconv = params["conv1_w"], params["conv1_b"]   # (h1,C,3,3), (h1,)
    w1, b1 = params["fc1_w"], params["fc1_b"]             # (h2, HW*(h1+1)), (h2,)
    wa, ba = params["fc_a_w"], params["fc_a_b"]           # (A,h2), (A,)
    wv, bv = params["fc_v_w"], params["fc_v_b"]           # (1,h2), (1,)
    h1, C = wconv.shape[0], wconv.shape[1]
    h2, n_in = w1.shape
    A = wa.shape[0]
    HW = n_in // (h1 + 1)
    assert n_in == HW * (h1 + 1)

    hi = lax.Precision.HIGHEST
    w1_conv = w1[:, : h1 * HW].reshape(h2, h1, HW)                       # [j, c, hw]
    w1_y = w1[:, h1 * HW:]                                               # [j, hw]
    wconv_taps = jnp.transpose(wconv, (2, 3, 1, 0)).reshape(9, C, h1)    # [t, cin, c]

    # Fold conv1 into fc1 (valid: no nonlinearity between conv1 and fc1 in the module).
    #   w_in[(hw*9 + t)*C + cin, j] = sum_c w1[j, c*HW + hw] * wconv[c, cin, t]
    w_in_conv = jnp.einsum("jch,tic->htij", w1_conv, wconv_taps,
                           precision=hi).reshape(HW * 9 * C, h2)
    w_in = jnp.concatenate([w_in_conv, w1_y.T], axis=0)                  # (HW*(9C+1), h2)
    b_in = (b1 + jnp.einsum("c,jch->j", bconv, w1_conv,
                            precision=hi)).reshape(1, h2)

    w_head = jnp.concatenate([wa.T, wv.T], axis=1)                       # (h2, A+1)
    b_head = jnp.concatenate([ba, bv]).reshape(1, A + 1)                 # (1, A+1)
    return {"w_in": w_in, "b_in": b_in, "w_head": w_head, "b_head": b_head}


@jax.jit
def network_old_forward(image, cmd_id, prepared):
    # TODO(synk): the torch module only supports batch==1 (it just prints otherwise);
    # same restriction here.  Batching plus a "parallel" grid axis would be the only
    # way to use v7x's second TensorCore, but it changes the module's contract.
    B, C, H, W = image.shape
    assert B == 1
    HW = H * W
    w_in, b_in = prepared["w_in"], prepared["b_in"]
    w_head, b_head = prepared["w_head"], prepared["b_head"]
    num_actions = w_head.shape[1] - 1
    assert w_in.shape[0] == HW * (9 * C + 1)

    # Per-call glue: image layout only (transpose, pad, im2col, channel select, flatten).
    img_chw = image[0]                                                # (C, H, W)
    img_hwc = jnp.transpose(img_chw, (1, 2, 0))                       # (H, W, C)
    padded = jnp.pad(img_hwc, ((1, 1), (1, 1), (0, 0)))               # (H+2, W+2, C)
    patches = jnp.stack([padded[dy:dy + H, dx:dx + W, :]
                         for dy in range(3) for dx in range(3)], axis=2)   # (H, W, 9, C)
    cmd = cmd_id.astype(jnp.int32)[0, 0]
    # TODO(synk): torch raises on cmd_id outside [0, C); jnp.take clamps/fills instead.
    y_row = jnp.take(img_chw, cmd, axis=0).reshape(1, HW)             # (1, HW)
    x_in = jnp.concatenate([patches.reshape(1, HW * 9 * C), y_row], axis=1)  # (1, K)

    vmem = pl.BlockSpec(memory_space=pltpu.MemorySpace.VMEM)
    out = pl.pallas_call(
        network_old_kernel,
        out_shape=jax.ShapeDtypeStruct((1, num_actions + 1), jnp.float32),
        in_specs=[vmem, vmem, vmem, vmem, vmem],
        out_specs=vmem,
    )(x_in, w_in, b_in, w_head, b_head)

    return out[:, :num_actions], out[:, num_actions:]


def network_old_reference(image, cmd_id, params):
    """Pure-JAX reference mirroring the PyTorch forward exactly."""
    with jax.default_matmul_precision("highest"):
        conv = lax.conv_general_dilated(
            image, params["conv1_w"], window_strides=(1, 1),
            padding=((1, 1), (1, 1)),
            dimension_numbers=("NCHW", "OIHW", "NCHW"),
            precision=lax.Precision.HIGHEST)
        conv = conv + params["conv1_b"][None, :, None, None]
        idx = cmd_id.astype(jnp.int32)[0, 0]
        y = jnp.take(image, idx, axis=1)[:, None, :, :]
        x = jnp.concatenate([conv, y], axis=1)
        flat = x.reshape(x.shape[0], -1)
        hid = jax.nn.relu(flat @ params["fc1_w"].T + params["fc1_b"])
        logits = hid @ params["fc_a_w"].T + params["fc_a_b"]
        val = hid @ params["fc_v_w"].T + params["fc_v_b"]
        return jax.nn.softmax(logits, axis=1), val


if __name__ == "__main__":
    # Small shapes consistent with the module's __init__.
    H, W, C = 8, 8, 4
    hidden1, hidden2, num_actions = 8, 32, 4

    key = jax.random.PRNGKey(0)
    ks = jax.random.split(key, 10)
    params = {
        "conv1_w": 0.1 * jax.random.normal(ks[0], (hidden1, C, 3, 3), jnp.float32),
        "conv1_b": 0.1 * jax.random.normal(ks[1], (hidden1,), jnp.float32),
        "fc1_w": 0.05 * jax.random.normal(
            ks[2], (hidden2, H * W * (hidden1 + 1)), jnp.float32),
        "fc1_b": 0.1 * jax.random.normal(ks[3], (hidden2,), jnp.float32),
        "fc_a_w": 0.1 * jax.random.normal(ks[4], (num_actions, hidden2), jnp.float32),
        "fc_a_b": 0.1 * jax.random.normal(ks[5], (num_actions,), jnp.float32),
        "fc_v_w": 0.1 * jax.random.normal(ks[6], (1, hidden2), jnp.float32),
        "fc_v_b": 0.1 * jax.random.normal(ks[7], (1,), jnp.float32),
    }
    image = jax.random.normal(ks[8], (1, C, H, W), jnp.float32)
    cmd_id = jnp.array([[2.0]], dtype=jnp.float32)   # like torch: float, .long()'d

    prepared = prepare_network_old_params(params)    # one-time weight prep / folding
    probs, value = network_old_forward(image, cmd_id, prepared)
    jax.block_until_ready((probs, value))

    ref_p, ref_v = network_old_reference(image, cmd_id, params)
    assert probs.shape == (1, num_actions) and value.shape == (1, 1)
    np.testing.assert_allclose(np.asarray(probs), np.asarray(ref_p),
                               rtol=1e-3, atol=1e-3)
    np.testing.assert_allclose(np.asarray(value), np.asarray(ref_v),
                               rtol=1e-3, atol=1e-3)
    print("KERNEL_OK")
</pallas_src>

<mosaic_0001>
module attributes {stable_mosaic.version = 11 : i64} {
  func.func @network_old_kernel(%arg0: memref<1x2368xf32, #tpu.memory_space<vmem>>, %arg1: memref<2368x32xf32, #tpu.memory_space<vmem>>, %arg2: memref<1x32xf32, #tpu.memory_space<vmem>>, %arg3: memref<32x5xf32, #tpu.memory_space<vmem>>, %arg4: memref<1x5xf32, #tpu.memory_space<vmem>>, %arg5: memref<1x5xf32, #tpu.memory_space<vmem>>) attributes {dimension_semantics = [], scalar_prefetch = 0 : i64, scratch_operands = 0 : i64, tpu.core_type = #tpu.core_type<tc>} {
    %c0 = arith.constant 0 : index
    %c0_0 = arith.constant 0 : index
    %0 = vector.load %arg0[%c0, %c0_0] : memref<1x2368xf32, #tpu.memory_space<vmem>>, vector<1x2368xf32>
    %c0_1 = arith.constant 0 : index
    %c0_2 = arith.constant 0 : index
    %1 = vector.load %arg1[%c0_1, %c0_2] : memref<2368x32xf32, #tpu.memory_space<vmem>>, vector<2368x32xf32>
    %cst = arith.constant dense<0.000000e+00> : vector<1x32xf32>
    %2 = tpu.matmul %0, %1, %cst {dimension_numbers = #tpu.dot_dimension_numbers<[1], [0], [0], [1], [0, 0, 1, 1], [], []>} : vector<1x2368xf32>, vector<2368x32xf32>, vector<1x32xf32> -> vector<1x32xf32>
    %c0_3 = arith.constant 0 : index
    %c0_4 = arith.constant 0 : index
    %3 = vector.load %arg2[%c0_3, %c0_4] : memref<1x32xf32, #tpu.memory_space<vmem>>, vector<1x32xf32>
    %4 = arith.addf %2, %3 : vector<1x32xf32>
    %cst_5 = arith.constant 0.000000e+00 : f32
    %5 = vector.broadcast %cst_5 : f32 to vector<1x32xf32>
    %6 = arith.maximumf %4, %5 : vector<1x32xf32>
    %c0_6 = arith.constant 0 : index
    %c0_7 = arith.constant 0 : index
    %7 = vector.load %arg3[%c0_6, %c0_7] : memref<32x5xf32, #tpu.memory_space<vmem>>, vector<32x5xf32>
    %cst_8 = arith.constant dense<0.000000e+00> : vector<1x5xf32>
    %8 = tpu.matmul %6, %7, %cst_8 {dimension_numbers = #tpu.dot_dimension_numbers<[1], [0], [0], [1], [0, 0, 1, 1], [], []>} : vector<1x32xf32>, vector<32x5xf32>, vector<1x5xf32> -> vector<1x5xf32>
    %c0_9 = arith.constant 0 : index
    %c0_10 = arith.constant 0 : index
    %9 = vector.load %arg4[%c0_9, %c0_10] : memref<1x5xf32, #tpu.memory_space<vmem>>, vector<1x5xf32>
    %10 = arith.addf %8, %9 : vector<1x5xf32>
    %11 = tpu.iota {dimensions = array<i32: 1>} : vector<1x5xi32>
    %c4_i32 = arith.constant 4 : i32
    %12 = vector.broadcast %c4_i32 : i32 to vector<1x5xi32>
    %13 = arith.cmpi slt, %11, %12 : vector<1x5xi32>
    %cst_11 = arith.constant -1.000000e+30 : f32
    %14 = vector.broadcast %cst_11 : f32 to vector<1x5xf32>
    %15 = arith.select %13, %10, %14 : vector<1x5xi1>, vector<1x5xf32>
    %cst_12 = arith.constant dense<0xFF800000> : vector<1xf32>
    %16 = vector.multi_reduction <maximumf>, %15, %cst_12 [1] : vector<1x5xf32> to vector<1xf32>
    %17 = vector.shape_cast %16 : vector<1xf32> to vector<1x1xf32>
    %18 = vector.broadcast %17 : vector<1x1xf32> to vector<1x5xf32>
    %19 = arith.subf %15, %18 : vector<1x5xf32>
    %20 = math.exp %19 : vector<1x5xf32>
    %cst_13 = arith.constant dense<0.000000e+00> : vector<1xf32>
    %21 = vector.multi_reduction <add>, %20, %cst_13 [1] : vector<1x5xf32> to vector<1xf32>
    %22 = vector.shape_cast %21 : vector<1xf32> to vector<1x1xf32>
    %23 = vector.broadcast %22 : vector<1x1xf32> to vector<1x5xf32>
    %24 = arith.divf %20, %23 : vector<1x5xf32>
    %25 = arith.select %13, %24, %10 : vector<1x5xi1>, vector<1x5xf32>
    %c0_14 = arith.constant 0 : index
    %c0_15 = arith.constant 0 : index
    %26 = vector.load %arg5[%c0_14, %c0_15] : memref<1x5xf32, #tpu.memory_space<vmem>>, vector<1x5xf32>
    tpu.vector_store %arg5[%c0_14, %c0_15], %25 {strides = array<i32>} : memref<1x5xf32, #tpu.memory_space<vmem>>, vector<1x5xf32>,
    return
  }
}

</mosaic_0001>

<bundles_post_ra>
// kernel: network_old_forward.1
= control target key start
LH: loop header
LB: loop body
LE: loop exit
PB: predicated region body
PF: predicated region fallthrough
CT: control target
= control target key end

     0   :  { %v323_v35 = vlaneseq  ;;  %vm417_vm0 = vcmask 523264   ;;  %vm1590_vm1 = vmmov 0   ;;  %vm1126_vm2 = vcmask 261120   ;;  %s2630_s1 = inlined_call_operand.vmem [shape: f32[2368,32], index: 1, kind: input, shape index: {}]   ;;  %s2631_s0 = inlined_call_operand.vmem [shape: f32[1,2368], index: 0, kind: input, shape index: {}]   ;;  %s2632_s3 = inlined_call_operand.vmem [shape: f32[32,5], index: 3, kind: input, shape index: {}]   ;;  %s2633_s2 = inlined_call_operand.vmem [shape: f32[1,32], index: 2, kind: input, shape index: {}]   ;;  %s2634_s4 = inlined_call_operand.vmem [shape: f32[1,5], index: 4, kind: input, shape index: {}]   ;;  %s2635_s5 = inlined_call_operand.vmem [shape: f32[1,5], index: 5, kind: output, shape index: {}]  }
   0x1   :  { %v54_v0 = vld [vmem:[%s2630_s1 + $0xf8] sm:$0xff]  ;;  %v53_v2 = vld [vmem:[%s2630_s1 + $0xf0] sm:$0xff]  ;;  %v52_v6 = vld [vmem:[%s2630_s1 + $0xe8] sm:$0xff]  ;;  %vm1204_vm4 = vcmask 32768  }
   0x2   :  { %v38_v1 = vld [vmem:[%s2630_s1 + $0x78] sm:$0xff]  ;;  %1224 = vmatprep.subr.mxu0 %v54_v0  ;;  %v37_v4 = vld [vmem:[%s2630_s1 + $0x70] sm:$0xff]  ;;  %v36_v8 = vld [vmem:[%s2630_s1 + $0x68] sm:$0xff]  ;;  %v1751_v44 = vshrl.u32 %v323_v35, 7 }
   0x3   :  { %v86_v3 = vld [vmem:[%s2630_s1 + $0x1f8] sm:$0xff]  ;;  %1225 = vmatpush3.msra.mxu0 %v38_v1  ;;  %v85_v7 = vld [vmem:[%s2630_s1 + $0x1f0] sm:$0xff]  ;;  %v84_v10 = vld [vmem:[%s2630_s1 + $0x1e8] sm:$0xff] }
   0x4   :  { %v70_v5 = vld [vmem:[%s2630_s1 + $0x178] sm:$0xff]  ;;  %1259 = vmatprep.subr.mxu1 %v86_v3  ;;  %1226 = vmatprep.subr.mxu0 %v53_v2  ;;  %v69_v9 = vld [vmem:[%s2630_s1 + $0x170] sm:$0xff]  ;;  %v51_v11 = vld [vmem:[%s2630_s1 + $0xe0] sm:$0xff]  ;;  %v1778_v53 = vsub.s32 1, %v1751_v44  ;;  %v1798_v59 = vsub.s32 0, %v1751_v44  ;;  %v337_v1 = vsub.s32 3, %v1751_v44 }
   0x5   :  { %1260 = vmatpush3.msra.mxu1 %v70_v5  ;;  %1227 = vmatpush3.msra.mxu0 %v37_v4  ;;  %v68_v12 = vld [vmem:[%s2630_s1 + $0x168] sm:$0xff]  ;;  %v35_v13 = vld [vmem:[%s2630_s1 + $0x60] sm:$0xff]  ;;  %v50_v15 = vld [vmem:[%s2630_s1 + $0xd8] sm:$0xff]  ;;  %v1819_v3 = vsub.s32 2, %v1751_v44 }
   0x6   :  { %1261 = vmatprep.subr.mxu1 %v85_v7  ;;  %1228 = vmatprep.subr.mxu0 %v52_v6  ;;  %v83_v14 = vld [vmem:[%s2630_s1 + $0x1e0] sm:$0xff]  ;;  %v34_v17 = vld [vmem:[%s2630_s1 + $0x58] sm:$0xff]  ;;  %v49_v19 = vld [vmem:[%s2630_s1 + $0xd0] sm:$0xff] }
   0x7   :  { %1262 = vmatpush3.msra.mxu1 %v69_v9  ;;  %1229 = vmatpush3.msra.mxu0 %v36_v8  ;;  %v67_v16 = vld [vmem:[%s2630_s1 + $0x160] sm:$0xff]  ;;  %v82_v18 = vld [vmem:[%s2630_s1 + $0x1d8] sm:$0xff]  ;;  %v33_v21 = vld [vmem:[%s2630_s1 + $0x50] sm:$0xff] }
   0x8   :  { %1263 = vmatprep.subr.mxu1 %v84_v10  ;;  %1230 = vmatprep.subr.mxu0 %v51_v11  ;;  %v66_v20 = vld [vmem:[%s2630_s1 + $0x158] sm:$0xff]  ;;  %v81_v22 = vld [vmem:[%s2630_s1 + $0x1d0] sm:$0xff]  ;;  %v48_v23 = vld [vmem:[%s2630_s1 + $0xc8] sm:$0xff] }
   0x9   :  { %1264 = vmatpush3.msra.mxu1 %v68_v12  ;;  %1231 = vmatpush3.msra.mxu0 %v35_v13  ;;  %v65_v24 = vld [vmem:[%s2630_s1 + $0x150] sm:$0xff]  ;;  %v32_v25 = vld [vmem:[%s2630_s1 + $0x48] sm:$0xff]  ;;  %v47_v27 = vld [vmem:[%s2630_s1 + $0xc0] sm:$0xff] }
   0xa   :  { %1265 = vmatprep.subr.mxu1 %v83_v14  ;;  %1232 = vmatprep.subr.mxu0 %v50_v15  ;;  %v80_v26 = vld [vmem:[%s2630_s1 + $0x1c8] sm:$0xff]  ;;  %v31_v29 = vld [vmem:[%s2630_s1 + $0x40] sm:$0xff]  ;;  %v46_v31 = vld [vmem:[%s2630_s1 + $0xb8] sm:$0xff] }
   0xb   :  { %1266 = vmatpush3.msra.mxu1 %v67_v16  ;;  %1233 = vmatpush3.msra.mxu0 %v34_v17  ;;  %v64_v28 = vld [vmem:[%s2630_s1 + $0x148] sm:$0xff]  ;;  %v79_v30 = vld [vmem:[%s2630_s1 + $0x1c0] sm:$0xff]  ;;  %v30_v33 = vld [vmem:[%s2630_s1 + $0x38] sm:$0xff] }
   0xc   :  { %1267 = vmatprep.subr.mxu1 %v82_v18  ;;  %1234 = vmatprep.subr.mxu0 %v49_v19  ;;  %v63_v32 = vld [vmem:[%s2630_s1 + $0x140] sm:$0xff]  ;;  %v78_v34 = vld [vmem:[%s2630_s1 + $0x1b8] sm:$0xff]  ;;  %v45_v36 = vld [vmem:[%s2630_s1 + $0xb0] sm:$0xff] }
   0xd   :  { %1268 = vmatpush3.msra.mxu1 %v66_v20  ;;  %1235 = vmatpush3.msra.mxu0 %v33_v21  ;;  %v62_v37 = vld [vmem:[%s2630_s1 + $0x138] sm:$0xff]  ;;  %v29_v38 = vld [vmem:[%s2630_s1 + $0x30] sm:$0xff]  ;;  %v44_v40 = vld [vmem:[%s2630_s1 + $0xa8] sm:$0xff] }
   0xe   :  { %1269 = vmatprep.subr.mxu1 %v81_v22  ;;  %1236 = vmatprep.subr.mxu0 %v48_v23  ;;  %v77_v39 = vld [vmem:[%s2630_s1 + $0x1b0] sm:$0xff]  ;;  %v28_v42 = vld [vmem:[%s2630_s1 + $0x28] sm:$0xff]  ;;  %v43_v45 = vld [vmem:[%s2630_s1 + $0xa0] sm:$0xff] }
   0xf   :  { %1270 = vmatpush3.msra.mxu1 %v65_v24  ;;  %1237 = vmatpush3.msra.mxu0 %v32_v25  ;;  %v61_v41 = vld [vmem:[%s2630_s1 + $0x130] sm:$0xff]  ;;  %v76_v43 = vld [vmem:[%s2630_s1 + $0x1a8] sm:$0xff]  ;;  %v27_v47 = vld [vmem:[%s2630_s1 + $0x20] sm:$0xff] }
  0x10   :  { %1271 = vmatprep.subr.mxu1 %v80_v26  ;;  %1238 = vmatprep.subr.mxu0 %v47_v27  ;;  %v60_v46 = vld [vmem:[%s2630_s1 + $0x128] sm:$0xff]  ;;  %v75_v48 = vld [vmem:[%s2630_s1 + $0x1a0] sm:$0xff]  ;;  %v42_v49 = vld [vmem:[%s2630_s1 + $0x98] sm:$0xff] }
  0x11   :  { %1272 = vmatpush3.msra.mxu1 %v64_v28  ;;  %1239 = vmatpush3.msra.mxu0 %v31_v29  ;;  %v59_v50 = vld [vmem:[%s2630_s1 + $0x120] sm:$0xff]  ;;  %v26_v51 = vld [vmem:[%s2630_s1 + $0x18] sm:$0xff]  ;;  %v41_v54 = vld [vmem:[%s2630_s1 + $0x90] sm:$0xff] }
  0x12   :  { %1273 = vmatprep.subr.mxu1 %v79_v30  ;;  %1240 = vmatprep.subr.mxu0 %v46_v31  ;;  %v74_v52 = vld [vmem:[%s2630_s1 + $0x198] sm:$0xff]  ;;  %v1789_v56 = vld [vmem:[%s2631_s0] sm:$0xff]  ;;  %v25_v57 = vld [vmem:[%s2630_s1 + $0x10] sm:$0xff] }
  0x13   :  { %1274 = vmatpush3.msra.mxu1 %v63_v32  ;;  %1241 = vmatpush3.msra.mxu0 %v30_v33  ;;  %v58_v55 = vld [vmem:[%s2630_s1 + $0x118] sm:$0xff]  ;;  %v73_v58 = vld [vmem:[%s2630_s1 + $0x190] sm:$0xff]  ;;  %v40_v60 = vld [vmem:[%s2630_s1 + $0x88] sm:$0xff]  ;;  %v330_v0 = vrot.slane %v1789_v56, %v1778_v53  ;;  %v326_v6 = vrot.slane %v1789_v56, %v1798_v59  ;;  %v338_v10 = vrot.slane %v1789_v56, %v337_v1 }
  0x14   :  { %1275 = vmatprep.subr.mxu1 %v78_v34  ;;  %1242 = vmatprep.subr.mxu0 %v45_v36  ;;  %v57_v61 = vld [vmem:[%s2630_s1 + $0x110] sm:$0xff]  ;;  %v24_v62 = vld [vmem:[%s2630_s1 + $0x8] sm:$0xff]  ;;  %v39_v2 = vld [vmem:[%s2630_s1 + $0x80] sm:$0xff]  ;;  %v334_v12 = vrot.slane %v1789_v56, %v1819_v3 }
  0x15   :  { %1276 = vmatpush3.msra.mxu1 %v62_v37  ;;  %1243 = vmatpush3.msra.mxu0 %v29_v38  ;;  %v72_v63 = vld [vmem:[%s2630_s1 + $0x188] sm:$0xff]  ;;  %v23_v4 = vld [vmem:[%s2630_s1] sm:$0xff]  ;;  %v118_v8 = vld [vmem:[%s2630_s1 + $0x2f8] sm:$0xff] }
  0x16   :  { %1277 = vmatprep.subr.mxu1 %v77_v39  ;;  %1244 = vmatprep.subr.mxu0 %v44_v40  ;;  %v56_v5 = vld [vmem:[%s2630_s1 + $0x108] sm:$0xff]  ;;  %v71_v7 = vld [vmem:[%s2630_s1 + $0x180] sm:$0xff]  ;;  %v102_v11 = vld [vmem:[%s2630_s1 + $0x278] sm:$0xff] }
  0x17   :  { %1278 = vmatpush3.msra.mxu1 %v61_v41  ;;  %1245 = vmatpush3.msra.mxu0 %v28_v42  ;;  %v55_v9 = vld [vmem:[%s2630_s1 + $0x100] sm:$0xff]  ;;  %v117_v13 = vld [vmem:[%s2630_s1 + $0x2f0] sm:$0xff]  ;;  %v150_v14 = vld [vmem:[%s2630_s1 + $0x3f8] sm:$0xff] }
  0x18   :  { %1279 = vmatprep.subr.mxu1 %v76_v43  ;;  %1246 = vmatprep.subr.mxu0 %v43_v45  ;;  %v101_v15 = vld [vmem:[%s2630_s1 + $0x270] sm:$0xff]  ;;  %v134_v16 = vld [vmem:[%s2630_s1 + $0x378] sm:$0xff]  ;;  %v116_v17 = vld [vmem:[%s2630_s1 + $0x2e8] sm:$0xff] }
  0x19   :  { %1280 = vmatpush3.msra.mxu1 %v60_v46  ;;  %1247 = vmatpush3.msra.mxu0 %v27_v47  ;;  %v149_v18 = vld [vmem:[%s2630_s1 + $0x3f0] sm:$0xff]  ;;  %v100_v19 = vld [vmem:[%s2630_s1 + $0x268] sm:$0xff]  ;;  %v115_v21 = vld [vmem:[%s2630_s1 + $0x2e0] sm:$0xff] }
  0x1a   :  { %1281 = vmatprep.subr.mxu1 %v75_v48  ;;  %1248 = vmatprep.subr.mxu0 %v42_v49  ;;  %v133_v20 = vld [vmem:[%s2630_s1 + $0x370] sm:$0xff]  ;;  %v148_v22 = vld [vmem:[%s2630_s1 + $0x3e8] sm:$0xff]  ;;  %v99_v23 = vld [vmem:[%s2630_s1 + $0x260] sm:$0xff] }
  0x1b   :  { %1282 = vmatpush3.msra.mxu1 %v59_v50  ;;  %1249 = vmatpush3.msra.mxu0 %v26_v51  ;;  %v132_v24 = vld [vmem:[%s2630_s1 + $0x368] sm:$0xff]  ;;  %v114_v25 = vld [vmem:[%s2630_s1 + $0x2d8] sm:$0xff]  ;;  %v147_v26 = vld [vmem:[%s2630_s1 + $0x3e0] sm:$0xff] }
  0x1c   :  { %1283 = vmatprep.subr.mxu1 %v74_v52  ;;  %1250 = vmatprep.subr.mxu0 %v41_v54  ;;  %v98_v27 = vld [vmem:[%s2630_s1 + $0x258] sm:$0xff]  ;;  %v131_v28 = vld [vmem:[%s2630_s1 + $0x360] sm:$0xff]  ;;  %v113_v29 = vld [vmem:[%s2630_s1 + $0x2d0] sm:$0xff] }
  0x1d   :  { %1284 = vmatpush3.msra.mxu1 %v58_v55  ;;  %1251 = vmatpush3.msra.mxu0 %v25_v57  ;;  %v146_v30 = vld [vmem:[%s2630_s1 + $0x3d8] sm:$0xff]  ;;  %v97_v31 = vld [vmem:[%s2630_s1 + $0x250] sm:$0xff]  ;;  %v112_v33 = vld [vmem:[%s2630_s1 + $0x2c8] sm:$0xff] }
  0x1e   :  { %1285 = vmatprep.subr.mxu1 %v73_v58  ;;  %1252 = vmatprep.subr.mxu0 %v40_v60  ;;  %v130_v32 = vld [vmem:[%s2630_s1 + $0x358] sm:$0xff]  ;;  %v145_v34 = vld [vmem:[%s2630_s1 + $0x3d0] sm:$0xff]  ;;  %v96_v36 = vld [vmem:[%s2630_s1 + $0x248] sm:$0xff] }
  0x1f   :  { %1286 = vmatpush3.msra.mxu1 %v57_v61  ;;  %1253 = vmatpush3.msra.mxu0 %v24_v62  ;;  %v129_v37 = vld [vmem:[%s2630_s1 + $0x350] sm:$0xff]  ;;  %v111_v38 = vld [vmem:[%s2630_s1 + $0x2c0] sm:$0xff]  ;;  %v144_v39 = vld [vmem:[%s2630_s1 + $0x3c8] sm:$0xff] }
  0x20   :  { %1287 = vmatprep.subr.mxu1 %v72_v63  ;;  %1254 = vmatprep.subr.mxu0 %v39_v2  ;;  %v95_v40 = vld [vmem:[%s2630_s1 + $0x240] sm:$0xff]  ;;  %v128_v41 = vld [vmem:[%s2630_s1 + $0x348] sm:$0xff]  ;;  %v110_v42 = vld [vmem:[%s2630_s1 + $0x2b8] sm:$0xff] }
  0x21   :  { %484 = vmatprep.mubr.f32.mxu0 %v330_v0  ;;  %1255 = vmatpush3.msra.mxu0 %v23_v4  ;;  %v143_v43 = vld [vmem:[%s2630_s1 + $0x3c0] sm:$0xff]  ;;  %v94_v45 = vld [vmem:[%s2630_s1 + $0x238] sm:$0xff]  ;;  %v109_v47 = vld [vmem:[%s2630_s1 + $0x2b0] sm:$0xff] }
  0x22   :  { %1288 = vmatpush3.msra.mxu1 %v56_v5  ;;  %485 = vmatmul.mubr.f32.vlgmr.msra.gmra.mxu0 %v326_v6  ;;  %v127_v46 = vld [vmem:[%s2630_s1 + $0x340] sm:$0xff]  ;;  %v142_v48 = vld [vmem:[%s2630_s1 + $0x3b8] sm:$0xff]  ;;  %v93_v49 = vld [vmem:[%s2630_s1 + $0x230] sm:$0xff] }
  0x23   :  { %1289 = vmatprep.subr.mxu1 %v71_v7  ;;  %1294 = vmatprep.subr.mxu0 %v118_v8  ;;  %v126_v50 = vld [vmem:[%s2630_s1 + $0x338] sm:$0xff]  ;;  %v108_v51 = vld [vmem:[%s2630_s1 + $0x2a8] sm:$0xff]  ;;  %v141_v52 = vld [vmem:[%s2630_s1 + $0x3b0] sm:$0xff]  ;;  %v345_v7 = vsub.s32 5, %v1751_v44 }
  0x24   :  { %1290 = vmatpush3.msra.mxu1 %v55_v9  ;;  %554 = vmatprep.mubr.f32.mxu1 %v338_v10  ;;  %v92_v54 = vld [vmem:[%s2630_s1 + $0x228] sm:$0xff]  ;;  %v125_v55 = vld [vmem:[%s2630_s1 + $0x330] sm:$0xff]  ;;  %v107_v57 = vld [vmem:[%s2630_s1 + $0x2a0] sm:$0xff]  ;;  %v341_v10 = vsub.s32 4, %v1751_v44 }
  0x25   :  { %1295 = vmatpush3.msra.mxu0 %v102_v11  ;;  %555 = vmatmul.mubr.f32.vlgmr.msra.gmra.mxu1 %v334_v12  ;;  %v140_v58 = vld [vmem:[%s2630_s1 + $0x3a8] sm:$0xff]  ;;  %v91_v60 = vld [vmem:[%s2630_s1 + $0x220] sm:$0xff]  ;;  %v106_v62 = vld [vmem:[%s2630_s1 + $0x298] sm:$0xff] }
  0x26   :  { %1296 = vmatprep.subr.mxu0 %v117_v13  ;;  %1329 = vmatprep.subr.mxu1 %v150_v14  ;;  %v124_v61 = vld [vmem:[%s2630_s1 + $0x328] sm:$0xff]  ;;  %v139_v63 = vld [vmem:[%s2630_s1 + $0x3a0] sm:$0xff]  ;;  %v90_v0 = vld [vmem:[%s2630_s1 + $0x218] sm:$0xff] }
  0x27   :  { %1297 = vmatpush3.msra.mxu0 %v101_v15  ;;  %1330 = vmatpush3.msra.mxu1 %v134_v16  ;;  %v123_v2 = vld [vmem:[%s2630_s1 + $0x320] sm:$0xff]  ;;  %v105_v4 = vld [vmem:[%s2630_s1 + $0x290] sm:$0xff]  ;;  %v138_v5 = vld [vmem:[%s2630_s1 + $0x398] sm:$0xff]  ;;  %v353_v15 = vsub.s32 7, %v1751_v44 }
  0x28   :  { %1298 = vmatprep.subr.mxu0 %v116_v17  ;;  %1331 = vmatprep.subr.mxu1 %v149_v18  ;;  %v89_v6 = vld [vmem:[%s2630_s1 + $0x210] sm:$0xff]  ;;  %v122_v8 = vld [vmem:[%s2630_s1 + $0x318] sm:$0xff]  ;;  %v104_v9 = vld [vmem:[%s2630_s1 + $0x288] sm:$0xff]  ;;  %v346_v18 = vrot.slane %v1789_v56, %v345_v7 }
  0x29   :  { %1299 = vmatpush3.msra.mxu0 %v100_v19  ;;  %1332 = vmatpush3.msra.mxu1 %v133_v20  ;;  %v137_v11 = vld [vmem:[%s2630_s1 + $0x390] sm:$0xff]  ;;  %v88_v12 = vld [vmem:[%s2630_s1 + $0x208] sm:$0xff]  ;;  %v103_v14 = vld [vmem:[%s2630_s1 + $0x280] sm:$0xff]  ;;  %v349_v19 = vsub.s32 6, %v1751_v44 }
  0x2a   :  { %1300 = vmatprep.subr.mxu0 %v115_v21  ;;  %1333 = vmatprep.subr.mxu1 %v148_v22  ;;  %v121_v13 = vld [vmem:[%s2630_s1 + $0x310] sm:$0xff]  ;;  %v136_v16 = vld [vmem:[%s2630_s1 + $0x388] sm:$0xff]  ;;  %v87_v17 = vld [vmem:[%s2630_s1 + $0x200] sm:$0xff]  ;;  %v342_v21 = vrot.slane %v1789_v56, %v341_v10 }
  0x2b   :  { %1301 = vmatpush3.msra.mxu0 %v99_v23  ;;  %1334 = vmatpush3.msra.mxu1 %v132_v24  ;;  %v120_v20 = vld [vmem:[%s2630_s1 + $0x308] sm:$0xff]  ;;  %v135_v22 = vld [vmem:[%s2630_s1 + $0x380] sm:$0xff]  ;;  %v182_v23 = vld [vmem:[%s2630_s1 + $0x4f8] sm:$0xff] }
  0x2c   :  { %1302 = vmatprep.subr.mxu0 %v114_v25  ;;  %1335 = vmatprep.subr.mxu1 %v147_v26  ;;  %v119_v24 = vld [vmem:[%s2630_s1 + $0x300] sm:$0xff]  ;;  %v354_v25 = vrot.slane %v1789_v56, %v353_v15  ;;  %v166_v26 = vld [vmem:[%s2630_s1 + $0x478] sm:$0xff]  ;;  %v308_v44 = vld [vmem:[%s2630_s1 + $0x8e8] sm:$0xff] }
  0x2d   :  { %1303 = vmatpush3.msra.mxu0 %v98_v27  ;;  %1336 = vmatpush3.msra.mxu1 %v131_v28  ;;  %v350_v27 = vrot.slane %v1789_v56, %v349_v19  ;;  %v181_v28 = vld [vmem:[%s2630_s1 + $0x4f0] sm:$0xff]  ;;  %v198_v56 = vld [vmem:[%s2630_s1 + $0x578] sm:$0xff] }
  0x2e   :  { %1304 = vmatprep.subr.mxu0 %v113_v29  ;;  %1337 = vmatprep.subr.mxu1 %v146_v30  ;;  %v214_v29 = vld [vmem:[%s2630_s1 + $0x5f8] sm:$0xff]  ;;  %v165_v30 = vld [vmem:[%s2630_s1 + $0x470] sm:$0xff] }
  0x2f   :  { %1305 = vmatpush3.msra.mxu0 %v97_v31  ;;  %1338 = vmatpush3.msra.mxu1 %v130_v32  ;;  %v180_v31 = vld [vmem:[%s2630_s1 + $0x4e8] sm:$0xff]  ;;  %v213_v32 = vld [vmem:[%s2630_s1 + $0x5f0] sm:$0xff] }
  0x30   :  { %1306 = vmatprep.subr.mxu0 %v112_v33  ;;  %1339 = vmatprep.subr.mxu1 %v145_v34  ;;  %v164_v33 = vld [vmem:[%s2630_s1 + $0x468] sm:$0xff]  ;;  %v197_v34 = vld [vmem:[%s2630_s1 + $0x570] sm:$0xff] }
  0x31   :  { %1307 = vmatpush3.msra.mxu0 %v96_v36  ;;  %1340 = vmatpush3.msra.mxu1 %v129_v37  ;;  %v179_v36 = vld [vmem:[%s2630_s1 + $0x4e0] sm:$0xff]  ;;  %v212_v37 = vld [vmem:[%s2630_s1 + $0x5e8] sm:$0xff] }
  0x32   :  { %1308 = vmatprep.subr.mxu0 %v111_v38  ;;  %1341 = vmatprep.subr.mxu1 %v144_v39  ;;  %v163_v38 = vld [vmem:[%s2630_s1 + $0x460] sm:$0xff]  ;;  %v196_v39 = vld [vmem:[%s2630_s1 + $0x568] sm:$0xff] }
  0x33   :  { %1309 = vmatpush3.msra.mxu0 %v95_v40  ;;  %1342 = vmatpush3.msra.mxu1 %v128_v41  ;;  %v178_v40 = vld [vmem:[%s2630_s1 + $0x4d8] sm:$0xff]  ;;  %v211_v41 = vld [vmem:[%s2630_s1 + $0x5e0] sm:$0xff] }
  0x34   :  { %1310 = vmatprep.subr.mxu0 %v110_v42  ;;  %1343 = vmatprep.subr.mxu1 %v143_v43  ;;  %v162_v42 = vld [vmem:[%s2630_s1 + $0x458] sm:$0xff]  ;;  %v195_v43 = vld [vmem:[%s2630_s1 + $0x560] sm:$0xff] }
  0x35   :  { %1311 = vmatpush3.msra.mxu0 %v94_v45  ;;  %1344 = vmatpush3.msra.mxu1 %v127_v46  ;;  %v177_v45 = vld [vmem:[%s2630_s1 + $0x4d0] sm:$0xff]  ;;  %v210_v46 = vld [vmem:[%s2630_s1 + $0x5d8] sm:$0xff] }
  0x36   :  { %1312 = vmatprep.subr.mxu0 %v109_v47  ;;  %1345 = vmatprep.subr.mxu1 %v142_v48  ;;  %v161_v47 = vld [vmem:[%s2630_s1 + $0x450] sm:$0xff]  ;;  %v194_v48 = vld [vmem:[%s2630_s1 + $0x558] sm:$0xff] }
  0x37   :  { %1313 = vmatpush3.msra.mxu0 %v93_v49  ;;  %1346 = vmatpush3.msra.mxu1 %v126_v50  ;;  %v176_v49 = vld [vmem:[%s2630_s1 + $0x4c8] sm:$0xff]  ;;  %v209_v50 = vld [vmem:[%s2630_s1 + $0x5d0] sm:$0xff] }
  0x38   :  { %1314 = vmatprep.subr.mxu0 %v108_v51  ;;  %1347 = vmatprep.subr.mxu1 %v141_v52  ;;  %v160_v51 = vld [vmem:[%s2630_s1 + $0x448] sm:$0xff]  ;;  %v193_v52 = vld [vmem:[%s2630_s1 + $0x550] sm:$0xff] }
  0x39   :  { %1315 = vmatpush3.msra.mxu0 %v92_v54  ;;  %1348 = vmatpush3.msra.mxu1 %v125_v55  ;;  %v175_v54 = vld [vmem:[%s2630_s1 + $0x4c0] sm:$0xff]  ;;  %v208_v55 = vld [vmem:[%s2630_s1 + $0x5c8] sm:$0xff] }
  0x3a   :  { %1316 = vmatprep.subr.mxu0 %v107_v57  ;;  %1349 = vmatprep.subr.mxu1 %v140_v58  ;;  %v159_v57 = vld [vmem:[%s2630_s1 + $0x440] sm:$0xff]  ;;  %v192_v58 = vld [vmem:[%s2630_s1 + $0x548] sm:$0xff] }
  0x3b   :  { %1317 = vmatpush3.msra.mxu0 %v91_v60  ;;  %1350 = vmatpush3.msra.mxu1 %v124_v61  ;;  %v174_v60 = vld [vmem:[%s2630_s1 + $0x4b8] sm:$0xff]  ;;  %v207_v61 = vld [vmem:[%s2630_s1 + $0x5c0] sm:$0xff] }
  0x3c   :  { %1318 = vmatprep.subr.mxu0 %v106_v62  ;;  %1351 = vmatprep.subr.mxu1 %v139_v63  ;;  %v158_v62 = vld [vmem:[%s2630_s1 + $0x438] sm:$0xff]  ;;  %v191_v63 = vld [vmem:[%s2630_s1 + $0x540] sm:$0xff] }
  0x3d   :  { %1319 = vmatpush3.msra.mxu0 %v90_v0  ;;  %1352 = vmatpush3.msra.mxu1 %v123_v2  ;;  %v173_v0 = vld [vmem:[%s2630_s1 + $0x4b0] sm:$0xff]  ;;  %v206_v2 = vld [vmem:[%s2630_s1 + $0x5b8] sm:$0xff] }
  0x3e   :  { %1320 = vmatprep.subr.mxu0 %v105_v4  ;;  %1353 = vmatprep.subr.mxu1 %v138_v5  ;;  %v157_v4 = vld [vmem:[%s2630_s1 + $0x430] sm:$0xff]  ;;  %v190_v5 = vld [vmem:[%s2630_s1 + $0x538] sm:$0xff] }
  0x3f   :  { %1321 = vmatpush3.msra.mxu0 %v89_v6  ;;  %1354 = vmatpush3.msra.mxu1 %v122_v8  ;;  %v172_v6 = vld [vmem:[%s2630_s1 + $0x4a8] sm:$0xff]  ;;  %v205_v8 = vld [vmem:[%s2630_s1 + $0x5b0] sm:$0xff] }
  0x40   :  { %1322 = vmatprep.subr.mxu0 %v104_v9  ;;  %1355 = vmatprep.subr.mxu1 %v137_v11  ;;  %v156_v9 = vld [vmem:[%s2630_s1 + $0x428] sm:$0xff]  ;;  %v189_v11 = vld [vmem:[%s2630_s1 + $0x530] sm:$0xff] }
  0x41   :  { %1323 = vmatpush3.msra.mxu0 %v88_v12  ;;  %1356 = vmatpush3.msra.mxu1 %v121_v13  ;;  %v171_v12 = vld [vmem:[%s2630_s1 + $0x4a0] sm:$0xff]  ;;  %v204_v13 = vld [vmem:[%s2630_s1 + $0x5a8] sm:$0xff] }
  0x42   :  { %1324 = vmatprep.subr.mxu0 %v103_v14  ;;  %1357 = vmatprep.subr.mxu1 %v136_v16  ;;  %v155_v14 = vld [vmem:[%s2630_s1 + $0x420] sm:$0xff]  ;;  %v188_v16 = vld [vmem:[%s2630_s1 + $0x528] sm:$0xff] }
  0x43   :  { %1325 = vmatpush3.msra.mxu0 %v87_v17  ;;  %624 = vmatprep.mubr.f32.mxu0 %v346_v18  ;;  %v170_v17 = vld [vmem:[%s2630_s1 + $0x498] sm:$0xff]  ;;  %v203_v18 = vld [vmem:[%s2630_s1 + $0x5a0] sm:$0xff] }
  0x44   :  { %1358 = vmatpush3.msra.mxu1 %v120_v20  ;;  %625 = vmatmul.mubr.f32.vlgmr.msra.gmra.mxu0 %v342_v21  ;;  %v154_v20 = vld [vmem:[%s2630_s1 + $0x418] sm:$0xff]  ;;  %v187_v21 = vld [vmem:[%s2630_s1 + $0x520] sm:$0xff] }
  0x45   :  { %1359 = vmatprep.subr.mxu1 %v135_v22  ;;  %1364 = vmatprep.subr.mxu0 %v182_v23  ;;  %v169_v22 = vld [vmem:[%s2630_s1 + $0x490] sm:$0xff]  ;;  %v202_v23 = vld [vmem:[%s2630_s1 + $0x598] sm:$0xff] }
  0x46   :  { %1360 = vmatpush3.msra.mxu1 %v119_v24  ;;  %694 = vmatprep.mubr.f32.mxu1 %v354_v25  ;;  %v153_v24 = vld [vmem:[%s2630_s1 + $0x410] sm:$0xff]  ;;  %v186_v25 = vld [vmem:[%s2630_s1 + $0x518] sm:$0xff] }
  0x47   :  { %1365 = vmatpush3.msra.mxu0 %v166_v26  ;;  %695 = vmatmul.mubr.f32.vlgmr.msra.gmra.mxu1 %v350_v27  ;;  %v168_v26 = vld [vmem:[%s2630_s1 + $0x488] sm:$0xff] }
  0x48   :  { %1366 = vmatprep.subr.mxu0 %v181_v28  ;;  %1399 = vmatprep.subr.mxu1 %v214_v29  ;;  %v2216_v27 = vld [vmem:[%s2631_s0 + $0x8] sm:$0xff]  ;;  %v201_v28 = vld [vmem:[%s2630_s1 + $0x590] sm:$0xff] }
  0x49   :  { %1367 = vmatpush3.msra.mxu0 %v165_v30  ;;  %1400 = vmatpush3.msra.mxu1 %v198_v56  ;;  %v152_v29 = vld [vmem:[%s2630_s1 + $0x408] sm:$0xff]  ;;  %v185_v30 = vld [vmem:[%s2630_s1 + $0x510] sm:$0xff]  ;;  %v167_v56 = vld [vmem:[%s2630_s1 + $0x480] sm:$0xff] }
  0x4a   :  { %1368 = vmatprep.subr.mxu0 %v180_v31  ;;  %1401 = vmatprep.subr.mxu1 %v213_v32  ;;  %v200_v31 = vld [vmem:[%s2630_s1 + $0x588] sm:$0xff]  ;;  %v151_v32 = vld [vmem:[%s2630_s1 + $0x400] sm:$0xff] }
  0x4b   :  { %1369 = vmatpush3.msra.mxu0 %v164_v33  ;;  %1402 = vmatpush3.msra.mxu1 %v197_v34  ;;  %v362_v33 = vrot.slane %v2216_v27, %v1778_v53  ;;  %v184_v34 = vld [vmem:[%s2630_s1 + $0x508] sm:$0xff] }
  0x4c   :  { %1370 = vmatprep.subr.mxu0 %v179_v36  ;;  %1403 = vmatprep.subr.mxu1 %v212_v37  ;;  %v358_v36 = vrot.slane %v2216_v27, %v1798_v59  ;;  %v199_v37 = vld [vmem:[%s2630_s1 + $0x580] sm:$0xff] }
  0x4d   :  { %1371 = vmatpush3.msra.mxu0 %v163_v38  ;;  %1404 = vmatpush3.msra.mxu1 %v196_v39  ;;  %v246_v38 = vld [vmem:[%s2630_s1 + $0x6f8] sm:$0xff]  ;;  %v183_v39 = vld [vmem:[%s2630_s1 + $0x500] sm:$0xff] }
  0x4e   :  { %1372 = vmatprep.subr.mxu0 %v178_v40  ;;  %1405 = vmatprep.subr.mxu1 %v211_v41  ;;  %v370_v40 = vrot.slane %v2216_v27, %v337_v1  ;;  %v230_v41 = vld [vmem:[%s2630_s1 + $0x678] sm:$0xff] }
  0x4f   :  { %1373 = vmatpush3.msra.mxu0 %v162_v42  ;;  %1406 = vmatpush3.msra.mxu1 %v195_v43  ;;  %v366_v42 = vrot.slane %v2216_v27, %v1819_v3  ;;  %v245_v43 = vld [vmem:[%s2630_s1 + $0x6f0] sm:$0xff]  ;;  %v278_v1 = vld [vmem:[%s2630_s1 + $0x7f8] sm:$0xff] }
  0x50   :  { %1374 = vmatprep.subr.mxu0 %v177_v45  ;;  %1407 = vmatprep.subr.mxu1 %v210_v46  ;;  %v229_v45 = vld [vmem:[%s2630_s1 + $0x670] sm:$0xff]  ;;  %v262_v46 = vld [vmem:[%s2630_s1 + $0x778] sm:$0xff] }
  0x51   :  { %1375 = vmatpush3.msra.mxu0 %v161_v47  ;;  %1408 = vmatpush3.msra.mxu1 %v194_v48  ;;  %v244_v47 = vld [vmem:[%s2630_s1 + $0x6e8] sm:$0xff]  ;;  %v277_v48 = vld [vmem:[%s2630_s1 + $0x7f0] sm:$0xff] }
  0x52   :  { %1376 = vmatprep.subr.mxu0 %v176_v49  ;;  %1409 = vmatprep.subr.mxu1 %v209_v50  ;;  %v228_v49 = vld [vmem:[%s2630_s1 + $0x668] sm:$0xff]  ;;  %v261_v50 = vld [vmem:[%s2630_s1 + $0x770] sm:$0xff] }
  0x53   :  { %1377 = vmatpush3.msra.mxu0 %v160_v51  ;;  %1410 = vmatpush3.msra.mxu1 %v193_v52  ;;  %v243_v51 = vld [vmem:[%s2630_s1 + $0x6e0] sm:$0xff]  ;;  %v276_v52 = vld [vmem:[%s2630_s1 + $0x7e8] sm:$0xff] }
  0x54   :  { %1378 = vmatprep.subr.mxu0 %v175_v54  ;;  %1411 = vmatprep.subr.mxu1 %v208_v55  ;;  %v227_v54 = vld [vmem:[%s2630_s1 + $0x660] sm:$0xff]  ;;  %v260_v55 = vld [vmem:[%s2630_s1 + $0x768] sm:$0xff] }
  0x55   :  { %1379 = vmatpush3.msra.mxu0 %v159_v57  ;;  %1412 = vmatpush3.msra.mxu1 %v192_v58  ;;  %v242_v57 = vld [vmem:[%s2630_s1 + $0x6d8] sm:$0xff]  ;;  %v275_v58 = vld [vmem:[%s2630_s1 + $0x7e0] sm:$0xff] }
  0x56   :  { %1380 = vmatprep.subr.mxu0 %v174_v60  ;;  %1413 = vmatprep.subr.mxu1 %v207_v61  ;;  %v226_v60 = vld [vmem:[%s2630_s1 + $0x658] sm:$0xff]  ;;  %v259_v61 = vld [vmem:[%s2630_s1 + $0x760] sm:$0xff] }
  0x57   :  { %1381 = vmatpush3.msra.mxu0 %v158_v62  ;;  %1414 = vmatpush3.msra.mxu1 %v191_v63  ;;  %v241_v62 = vld [vmem:[%s2630_s1 + $0x6d0] sm:$0xff]  ;;  %v274_v63 = vld [vmem:[%s2630_s1 + $0x7d8] sm:$0xff] }
  0x58   :  { %1382 = vmatprep.subr.mxu0 %v173_v0  ;;  %1415 = vmatprep.subr.mxu1 %v206_v2  ;;  %v225_v0 = vld [vmem:[%s2630_s1 + $0x650] sm:$0xff]  ;;  %v258_v2 = vld [vmem:[%s2630_s1 + $0x758] sm:$0xff] }
  0x59   :  { %1383 = vmatpush3.msra.mxu0 %v157_v4  ;;  %1416 = vmatpush3.msra.mxu1 %v190_v5  ;;  %v240_v4 = vld [vmem:[%s2630_s1 + $0x6c8] sm:$0xff]  ;;  %v273_v5 = vld [vmem:[%s2630_s1 + $0x7d0] sm:$0xff] }
  0x5a   :  { %1384 = vmatprep.subr.mxu0 %v172_v6  ;;  %1417 = vmatprep.subr.mxu1 %v205_v8  ;;  %v224_v6 = vld [vmem:[%s2630_s1 + $0x648] sm:$0xff]  ;;  %v257_v8 = vld [vmem:[%s2630_s1 + $0x750] sm:$0xff] }
  0x5b   :  { %1385 = vmatpush3.msra.mxu0 %v156_v9  ;;  %1418 = vmatpush3.msra.mxu1 %v189_v11  ;;  %v239_v9 = vld [vmem:[%s2630_s1 + $0x6c0] sm:$0xff]  ;;  %v272_v11 = vld [vmem:[%s2630_s1 + $0x7c8] sm:$0xff] }
  0x5c   :  { %1386 = vmatprep.subr.mxu0 %v171_v12  ;;  %1419 = vmatprep.subr.mxu1 %v204_v13  ;;  %v223_v12 = vld [vmem:[%s2630_s1 + $0x640] sm:$0xff]  ;;  %v256_v13 = vld [vmem:[%s2630_s1 + $0x748] sm:$0xff] }
  0x5d   :  { %1387 = vmatpush3.msra.mxu0 %v155_v14  ;;  %1420 = vmatpush3.msra.mxu1 %v188_v16  ;;  %v238_v14 = vld [vmem:[%s2630_s1 + $0x6b8] sm:$0xff]  ;;  %v271_v16 = vld [vmem:[%s2630_s1 + $0x7c0] sm:$0xff] }
  0x5e   :  { %1388 = vmatprep.subr.mxu0 %v170_v17  ;;  %1421 = vmatprep.subr.mxu1 %v203_v18  ;;  %v222_v17 = vld [vmem:[%s2630_s1 + $0x638] sm:$0xff]  ;;  %v255_v18 = vld [vmem:[%s2630_s1 + $0x740] sm:$0xff] }
  0x5f   :  { %1389 = vmatpush3.msra.mxu0 %v154_v20  ;;  %1422 = vmatpush3.msra.mxu1 %v187_v21  ;;  %v237_v20 = vld [vmem:[%s2630_s1 + $0x6b0] sm:$0xff]  ;;  %v270_v21 = vld [vmem:[%s2630_s1 + $0x7b8] sm:$0xff] }
  0x60   :  { %1390 = vmatprep.subr.mxu0 %v169_v22  ;;  %1423 = vmatprep.subr.mxu1 %v202_v23  ;;  %v221_v22 = vld [vmem:[%s2630_s1 + $0x630] sm:$0xff]  ;;  %v254_v23 = vld [vmem:[%s2630_s1 + $0x738] sm:$0xff] }
  0x61   :  { %1391 = vmatpush3.msra.mxu0 %v153_v24  ;;  %1424 = vmatpush3.msra.mxu1 %v186_v25  ;;  %v236_v24 = vld [vmem:[%s2630_s1 + $0x6a8] sm:$0xff]  ;;  %v269_v25 = vld [vmem:[%s2630_s1 + $0x7b0] sm:$0xff] }
  0x62   :  { %1392 = vmatprep.subr.mxu0 %v168_v26  ;;  %1425 = vmatprep.subr.mxu1 %v201_v28  ;;  %v220_v26 = vld [vmem:[%s2630_s1 + $0x628] sm:$0xff]  ;;  %v253_v28 = vld [vmem:[%s2630_s1 + $0x730] sm:$0xff] }
  0x63   :  { %1393 = vmatpush3.msra.mxu0 %v152_v29  ;;  %1426 = vmatpush3.msra.mxu1 %v185_v30  ;;  %v235_v29 = vld [vmem:[%s2630_s1 + $0x6a0] sm:$0xff]  ;;  %v268_v30 = vld [vmem:[%s2630_s1 + $0x7a8] sm:$0xff] }
  0x64   :  { %1394 = vmatprep.subr.mxu0 %v167_v56  ;;  %1427 = vmatprep.subr.mxu1 %v200_v31  ;;  %v219_v56 = vld [vmem:[%s2630_s1 + $0x620] sm:$0xff]  ;;  %v252_v31 = vld [vmem:[%s2630_s1 + $0x728] sm:$0xff] }
  0x65   :  { %1395 = vmatpush3.msra.mxu0 %v151_v32  ;;  %764 = vmatprep.mubr.f32.mxu0 %v362_v33  ;;  %v234_v32 = vld [vmem:[%s2630_s1 + $0x698] sm:$0xff]  ;;  %v267_v33 = vld [vmem:[%s2630_s1 + $0x7a0] sm:$0xff] }
  0x66   :  { %1428 = vmatpush3.msra.mxu1 %v184_v34  ;;  %765 = vmatmul.mubr.f32.vlgmr.msra.gmra.mxu0 %v358_v36  ;;  %v218_v34 = vld [vmem:[%s2630_s1 + $0x618] sm:$0xff]  ;;  %v251_v36 = vld [vmem:[%s2630_s1 + $0x720] sm:$0xff] }
  0x67   :  { %1429 = vmatprep.subr.mxu1 %v199_v37  ;;  %1434 = vmatprep.subr.mxu0 %v246_v38  ;;  %v233_v37 = vld [vmem:[%s2630_s1 + $0x690] sm:$0xff]  ;;  %v266_v38 = vld [vmem:[%s2630_s1 + $0x798] sm:$0xff] }
  0x68   :  { %1430 = vmatpush3.msra.mxu1 %v183_v39  ;;  %834 = vmatprep.mubr.f32.mxu1 %v370_v40  ;;  %v217_v39 = vld [vmem:[%s2630_s1 + $0x610] sm:$0xff]  ;;  %v250_v40 = vld [vmem:[%s2630_s1 + $0x718] sm:$0xff] }
  0x69   :  { %1435 = vmatpush3.msra.mxu0 %v230_v41  ;;  %835 = vmatmul.mubr.f32.vlgmr.msra.gmra.mxu1 %v366_v42  ;;  %v232_v41 = vld [vmem:[%s2630_s1 + $0x688] sm:$0xff]  ;;  %v265_v42 = vld [vmem:[%s2630_s1 + $0x790] sm:$0xff] }
  0x6a   :  { %1436 = vmatprep.subr.mxu0 %v245_v43  ;;  %1469 = vmatprep.subr.mxu1 %v278_v1  ;;  %v216_v43 = vld [vmem:[%s2630_s1 + $0x608] sm:$0xff]  ;;  %v249_v1 = vld [vmem:[%s2630_s1 + $0x710] sm:$0xff] }
  0x6b   :  { %1437 = vmatpush3.msra.mxu0 %v229_v45  ;;  %1470 = vmatpush3.msra.mxu1 %v262_v46  ;;  %v231_v45 = vld [vmem:[%s2630_s1 + $0x680] sm:$0xff]  ;;  %v264_v46 = vld [vmem:[%s2630_s1 + $0x788] sm:$0xff] }
  0x6c   :  { %1438 = vmatprep.subr.mxu0 %v244_v47  ;;  %1471 = vmatprep.subr.mxu1 %v277_v48  ;;  %v215_v47 = vld [vmem:[%s2630_s1 + $0x600] sm:$0xff]  ;;  %v378_v48 = vrot.slane %v2216_v27, %v345_v7  ;;  %v310_v7 = vld [vmem:[%s2630_s1 + $0x8f8] sm:$0xff] }
  0x6d   :  { %1439 = vmatpush3.msra.mxu0 %v228_v49  ;;  %1472 = vmatpush3.msra.mxu1 %v261_v50  ;;  %v248_v49 = vld [vmem:[%s2630_s1 + $0x708] sm:$0xff]  ;;  %v374_v50 = vrot.slane %v2216_v27, %v341_v10  ;;  %v386_v10 = vrot.slane %v2216_v27, %v353_v15  ;;  %v293_v15 = vld [vmem:[%s2630_s1 + $0x870] sm:$0xff] }
  0x6e   :  { %1440 = vmatprep.subr.mxu0 %v243_v51  ;;  %1473 = vmatprep.subr.mxu1 %v276_v52  ;;  %v263_v51 = vld [vmem:[%s2630_s1 + $0x780] sm:$0xff] }
  0x6f   :  { %1441 = vmatpush3.msra.mxu0 %v227_v54  ;;  %1474 = vmatpush3.msra.mxu1 %v260_v55  ;;  %v247_v52 = vld [vmem:[%s2630_s1 + $0x700] sm:$0xff]  ;;  %v294_v54 = vld [vmem:[%s2630_s1 + $0x878] sm:$0xff]  ;;  %v382_v55 = vrot.slane %v2216_v27, %v349_v19  ;;  %v292_v27 = vld [vmem:[%s2630_s1 + $0x868] sm:$0xff] }
  0x70   :  { %1442 = vmatprep.subr.mxu0 %v242_v57  ;;  %1475 = vmatprep.subr.mxu1 %v275_v58  ;;  %v309_v57 = vld [vmem:[%s2630_s1 + $0x8f0] sm:$0xff]  ;;  %v318_v19 = vld [vmem:[%s2630_s1 + $0x938] sm:$0xff]  ;;  %v307_v58 = vld [vmem:[%s2630_s1 + $0x8e0] sm:$0xff] }
  0x71   :  { %1443 = vmatpush3.msra.mxu0 %v226_v60  ;;  %1476 = vmatpush3.msra.mxu1 %v259_v61  ;;  %v1589_v60 = vmov 0.0   ;;  %v317_v61 = vld [vmem:[%s2630_s1 + $0x930] sm:$0xff] }
  0x72   :  { %1444 = vmatprep.subr.mxu0 %v241_v62  ;;  %1477 = vmatprep.subr.mxu1 %v274_v63  ;;  %v291_v62 = vld [vmem:[%s2630_s1 + $0x860] sm:$0xff]  ;;  %v306_v63 = vld [vmem:[%s2630_s1 + $0x8d8] sm:$0xff] }
  0x73   :  { %1445 = vmatpush3.msra.mxu0 %v225_v0  ;;  %1478 = vmatpush3.msra.mxu1 %v258_v2  ;;  %v316_v0 = vld [vmem:[%s2630_s1 + $0x928] sm:$0xff]  ;;  %v290_v2 = vld [vmem:[%s2630_s1 + $0x858] sm:$0xff] }
  0x74   :  { %1446 = vmatprep.subr.mxu0 %v240_v4  ;;  %1479 = vmatprep.subr.mxu1 %v273_v5  ;;  %v305_v4 = vld [vmem:[%s2630_s1 + $0x8d0] sm:$0xff]  ;;  %v315_v5 = vld [vmem:[%s2630_s1 + $0x920] sm:$0xff] }
  0x75   :  { %1447 = vmatpush3.msra.mxu0 %v224_v6  ;;  %1480 = vmatpush3.msra.mxu1 %v257_v8  ;;  %v2509_v6 = vld [vmem:[%s2631_s0 + $0x10] sm:$0x7] }
  0x76   :  { %1448 = vmatprep.subr.mxu0 %v239_v9  ;;  %1481 = vmatprep.subr.mxu1 %v272_v11  ;;  %v289_v8 = vld [vmem:[%s2630_s1 + $0x850] sm:$0xff]  ;;  %v304_v9 = vld [vmem:[%s2630_s1 + $0x8c8] sm:$0xff]  ;;  %v314_v11 = vld [vmem:[%s2630_s1 + $0x918] sm:$0xff] }
  0x77   :  { %1449 = vmatpush3.msra.mxu0 %v223_v12  ;;  %1482 = vmatpush3.msra.mxu1 %v256_v13  ;;  %v288_v12 = vld [vmem:[%s2630_s1 + $0x848] sm:$0xff]  ;;  %v394_v13 = vrot.slane %v2509_v6, %v1778_v53  ;;  %v302_v53 = vld [vmem:[%s2630_s1 + $0x8b8] sm:$0xff] }
  0x78   :  { %1450 = vmatprep.subr.mxu0 %v238_v14  ;;  %1483 = vmatprep.subr.mxu1 %v271_v16  ;;  %v303_v14 = vld [vmem:[%s2630_s1 + $0x8c0] sm:$0xff] }
  0x79   :  { %1451 = vmatpush3.msra.mxu0 %v222_v17  ;;  %1484 = vmatpush3.msra.mxu1 %v255_v18  ;;  %v287_v16 = vld [vmem:[%s2630_s1 + $0x840] sm:$0xff]  ;;  %v313_v17 = vld [vmem:[%s2630_s1 + $0x910] sm:$0xff]  ;;  %v286_v18 = vld [vmem:[%s2630_s1 + $0x838] sm:$0xff] }
  0x7a   :  { %1452 = vmatprep.subr.mxu0 %v237_v20  ;;  %1485 = vmatprep.subr.mxu1 %v270_v21  ;;  %v312_v20 = vld [vmem:[%s2630_s1 + $0x908] sm:$0xff]  ;;  %v301_v21 = vld [vmem:[%s2630_s1 + $0x8b0] sm:$0xff] }
  0x7b   :  { %1453 = vmatpush3.msra.mxu0 %v221_v22  ;;  %1486 = vmatpush3.msra.mxu1 %v254_v23  ;;  %v285_v22 = vld [vmem:[%s2630_s1 + $0x830] sm:$0xff]  ;;  %v311_v23 = vld [vmem:[%s2630_s1 + $0x900] sm:$0xff] }
  0x7c   :  { %1454 = vmatprep.subr.mxu0 %v236_v24  ;;  %1487 = vmatprep.subr.mxu1 %v269_v25  ;;  %v300_v24 = vld [vmem:[%s2630_s1 + $0x8a8] sm:$0xff]  ;;  %v398_v25 = vrot.slane %v2509_v6, %v1819_v3  ;;  %v283_v3 = vld [vmem:[%s2630_s1 + $0x820] sm:$0xff] }
  0x7d   :  { %1455 = vmatpush3.msra.mxu0 %v220_v26  ;;  %1488 = vmatpush3.msra.mxu1 %v253_v28  ;;  %v284_v26 = vld [vmem:[%s2630_s1 + $0x828] sm:$0xff]  ;;  %v299_v28 = vld [vmem:[%s2630_s1 + $0x8a0] sm:$0xff] }
  0x7e   :  { %1456 = vmatprep.subr.mxu0 %v235_v29  ;;  %1489 = vmatprep.subr.mxu1 %v268_v30  ;;  %v298_v29 = vld [vmem:[%s2630_s1 + $0x898] sm:$0xff] }
  0x7f   :  { %1457 = vmatpush3.msra.mxu0 %v219_v56  ;;  %1490 = vmatpush3.msra.mxu1 %v252_v31  ;;  %v282_v30 = vld [vmem:[%s2630_s1 + $0x818] sm:$0xff]  ;;  %v297_v56 = vld [vmem:[%s2630_s1 + $0x890] sm:$0xff] }
  0x80   :  { %1458 = vmatprep.subr.mxu0 %v234_v32  ;;  %1491 = vmatprep.subr.mxu1 %v267_v33  ;;  %v281_v31 = vld [vmem:[%s2630_s1 + $0x810] sm:$0xff]  ;;  %v296_v32 = vld [vmem:[%s2630_s1 + $0x888] sm:$0xff] }
  0x81   :  { %1459 = vmatpush3.msra.mxu0 %v218_v34  ;;  %1492 = vmatpush3.msra.mxu1 %v251_v36  ;;  %v280_v33 = vld [vmem:[%s2630_s1 + $0x808] sm:$0xff]  ;;  %v295_v34 = vld [vmem:[%s2630_s1 + $0x880] sm:$0xff] }
  0x82   :  { %1460 = vmatprep.subr.mxu0 %v233_v37  ;;  %1493 = vmatprep.subr.mxu1 %v266_v38  ;;  %v279_v36 = vld [vmem:[%s2630_s1 + $0x800] sm:$0xff]  ;;  %v390_v37 = vrot.slane %v2509_v6, %v1798_v59  ;;  %v1124_v38 = vld [vmem:[%s2632_s3 + $0x18] sm:$0xff]  ;;  %v1122_v59 = vld [vmem:[%s2632_s3 + $0x8] sm:$0xff] }
  0x83   :  { %1461 = vmatpush3.msra.mxu0 %v217_v39  ;;  %1494 = vmatpush3.msra.mxu1 %v250_v40  ;;  %v1123_v39 = vld [vmem:[%s2632_s3 + $0x10] sm:$0xff]  ;;  %v1121_v40 = vld [vmem:[%s2632_s3] sm:$0xff] }
  0x84   :  { %1462 = vmatprep.subr.mxu0 %v232_v41  ;;  %1495 = vmatprep.subr.mxu1 %v265_v42 }
  0x85   :  { %1463 = vmatpush3.msra.mxu0 %v216_v43  ;;  %1496 = vmatpush3.msra.mxu1 %v249_v1 }
  0x86   :  { %1464 = vmatprep.subr.mxu0 %v231_v45  ;;  %1497 = vmatprep.subr.mxu1 %v264_v46 }
  0x87   :  { %1465 = vmatpush3.msra.mxu0 %v215_v47  ;;  %904 = vmatprep.mubr.f32.mxu0 %v378_v48 }
  0x88   :  { %1498 = vmatpush3.msra.mxu1 %v248_v49  ;;  %905 = vmatmul.mubr.f32.vlgmr.msra.gmra.mxu0 %v374_v50  ;;  %v319_v50 = vld [vmem:[%s2633_s2] sm:$0x1] }
  0x89   :  { %1499 = vmatprep.subr.mxu1 %v263_v51  ;;  %1504 = vmatprep.subr.mxu0 %v310_v7 }
  0x8a   :  { %1500 = vmatpush3.msra.mxu1 %v247_v52  ;;  %974 = vmatprep.mubr.f32.mxu1 %v386_v10 }
  0x8b   :  { %1505 = vmatpush3.msra.mxu0 %v294_v54  ;;  %975 = vmatmul.mubr.f32.vlgmr.msra.gmra.mxu1 %v382_v55 }
  0x8c   :  { %1506 = vmatprep.subr.mxu0 %v309_v57  ;;  %1553 = vmatprep.subr.mxu1 %v1589_v60 }
  0x8d   :  { %1507 = vmatpush3.msra.mxu0 %v293_v15  ;;  %1554 = vmatpush3.msra.mxu1 %v318_v19 }
  0x8e   :  { %1508 = vmatprep.subr.mxu0 %v308_v44  ;;  %1555 = vmatprep.subr.mxu1 %v1589_v60 }
  0x8f   :  { %1509 = vmatpush3.msra.mxu0 %v292_v27  ;;  %1556 = vmatpush3.msra.mxu1 %v317_v61 }
  0x90   :  { %1510 = vmatprep.subr.mxu0 %v307_v58  ;;  %1557 = vmatprep.subr.mxu1 %v1589_v60 }
  0x91   :  { %1511 = vmatpush3.msra.mxu0 %v291_v62  ;;  %1558 = vmatpush3.msra.mxu1 %v316_v0 }
  0x92   :  { %1512 = vmatprep.subr.mxu0 %v306_v63  ;;  %1559 = vmatprep.subr.mxu1 %v1589_v60 }
  0x93   :  { %1513 = vmatpush3.msra.mxu0 %v290_v2  ;;  %1560 = vmatpush3.msra.mxu1 %v315_v5 }
  0x94   :  { %1514 = vmatprep.subr.mxu0 %v305_v4  ;;  %1561 = vmatprep.subr.mxu1 %v1589_v60 }
  0x95   :  { %1515 = vmatpush3.msra.mxu0 %v289_v8  ;;  %1562 = vmatpush3.msra.mxu1 %v314_v11 }
  0x96   :  { %1516 = vmatprep.subr.mxu0 %v304_v9  ;;  %1563 = vmatprep.subr.mxu1 %v1589_v60 }
  0x97   :  { %1517 = vmatpush3.msra.mxu0 %v288_v12  ;;  %1044 = vmatprep.mubr.f32.mxu0 %v394_v13 }
  0x98   :  { %1518 = vmatprep.subr.mxu0 %v303_v14  ;;  %1564 = vmatpush3.msra.mxu1 %v313_v17 }
  0x99   :  { %1519 = vmatpush3.msra.mxu0 %v287_v16  ;;  %1565 = vmatprep.subr.mxu1 %v1589_v60 }
  0x9a   :  { %1520 = vmatprep.subr.mxu0 %v302_v53  ;;  %1566 = vmatpush3.msra.mxu1 %v312_v20  ;;  %v1201_v20 = vand.u32 127, %v323_v35 }
  0x9b   :  { %1521 = vmatpush3.msra.mxu0 %v286_v18  ;;  %1567 = vmatprep.subr.mxu1 %v1589_v60 }
  0x9c   :  { %1522 = vmatprep.subr.mxu0 %v301_v21  ;;  %1568 = vmatpush3.msra.mxu1 %v311_v23  ;;  %v1125_v21 = vld [vmem:[%s2634_s4] sm:$0x1]  ;;  %vm1202_vm3 = vcmp.lt.s32.totalorder %v1201_v20, 4 }
  0x9d   :  { %1523 = vmatpush3.msra.mxu0 %v285_v22  ;;  %1569 = vmatprep.mubr.msk.f32.mxu1 %vm1590_vm1, %v1589_v60 }
  0x9e   :  { %1524 = vmatprep.subr.mxu0 %v300_v24  ;;  %1570 = vmatmul.mubr.msk.f32.vlgmr.msra.gmra.mxu1 %vm417_vm0, %v398_v25 }
  0x9f   :  { %1525 = vmatpush3.msra.mxu0 %v284_v26  ;;  %1572 = vmatprep.subr.mxu1 %v1589_v60 }
  0xa0   :  { %1526 = vmatprep.subr.mxu0 %v299_v28  ;;  %1580 = vmatprep.mubr.msk.f32.mxu1 %vm1590_vm1, %v1589_v60 }
  0xa1   :  { %1527 = vmatpush3.msra.mxu0 %v283_v3  ;;  %1573 = vmatpush3.msra.mxu1 %v1124_v38 }
  0xa2   :  { %1528 = vmatprep.subr.mxu0 %v298_v29  ;;  %1574 = vmatprep.subr.mxu1 %v1589_v60 }
  0xa3   :  { %1529 = vmatpush3.msra.mxu0 %v282_v30  ;;  %1575 = vmatpush3.msra.mxu1 %v1123_v39 }
  0xa4   :  { %1530 = vmatprep.subr.mxu0 %v297_v56  ;;  %1576 = vmatprep.subr.mxu1 %v1589_v60 }
  0xa5   :  { %1531 = vmatpush3.msra.mxu0 %v281_v31  ;;  %1577 = vmatpush3.msra.mxu1 %v1122_v59 }
  0xa6   :  { %1532 = vmatprep.subr.mxu0 %v296_v32  ;;  %1578 = vmatprep.subr.mxu1 %v1589_v60 }
  0xa7   :  { %1533 = vmatpush3.msra.mxu0 %v280_v33  ;;  %1579 = vmatpush3.msra.mxu1 %v1121_v40 }
  0xa8   :  { %1534 = vmatprep.subr.mxu0 %v295_v34 }
  0xa9   :  { %1535 = vmatpush3.msra.mxu0 %v279_v36 }
  0xaa   :  { %1045 = vmatmul.mubr.f32.vlgmr.msra.gmra.mxu0 %v390_v37 }
  0xe2   :  { %v1256_v43 = vpop.f32.mrf.mxu0 }
  0xe4   :  { %v1257_v45 = vpop.f32.mrf.mxu0 }
  0xe5   :  { %v1291_v41 = vpop.f32.mrf.mxu1  ;;  %v1258_v48 = vadd.f32 %v1257_v45, %v1256_v43 }
  0xe7   :  { %v1292_v42 = vpop.f32.mrf.mxu1  ;;  %v487_v7 = vadd.f32 %v1258_v48, %v319_v50 }
  0xe8   :  { %v1293_v52 = vadd.f32 %v1292_v42, %v1291_v41 }
  0xea   :  { %v557_v15 = vadd.f32 %v1293_v52, %v487_v7 }
 0x104   :  { %v1326_v47 = vpop.f32.mrf.mxu0 }
 0x106   :  { %v1327_v51 = vpop.f32.mrf.mxu0 }
 0x107   :  { %v1361_v1 = vpop.f32.mrf.mxu1  ;;  %v1328_v55 = vadd.f32 %v1327_v51, %v1326_v47 }
 0x109   :  { %v1362_v46 = vpop.f32.mrf.mxu1  ;;  %v627_v19 = vadd.f32 %v1328_v55, %v557_v15 }
 0x10a   :  { %v1363_v27 = vadd.f32 %v1362_v46, %v1361_v1 }
 0x10c   :  { %v697_v63 = vadd.f32 %v1363_v27, %v627_v19 }
 0x126   :  { %v1396_v54 = vpop.f32.mrf.mxu0 }
 0x128   :  { %v1397_v44 = vpop.f32.mrf.mxu0 }
 0x129   :  { %v1431_v49 = vpop.f32.mrf.mxu1  ;;  %v1398_v61 = vadd.f32 %v1397_v44, %v1396_v54 }
 0x12b   :  { %v1432_v10 = vpop.f32.mrf.mxu1  ;;  %v767_v4 = vadd.f32 %v1398_v61, %v697_v63 }
 0x12c   :  { %v1433_v5 = vadd.f32 %v1432_v10, %v1431_v49 }
 0x12e   :  { %v837_v8 = vadd.f32 %v1433_v5, %v767_v4 }
 0x148   :  { %v1466_v60 = vpop.f32.mrf.mxu0 }
 0x14a   :  { %v1467_v2 = vpop.f32.mrf.mxu0 }
 0x14b   :  { %v1501_v57 = vpop.f32.mrf.mxu1  ;;  %v1468_v6 = vadd.f32 %v1467_v2, %v1466_v60 }
 0x14d   :  { %v1502_v58 = vpop.f32.mrf.mxu1  ;;  %v907_v9 = vadd.f32 %v1468_v6, %v837_v8 }
 0x14e   :  { %v1503_v11 = vadd.f32 %v1502_v58, %v1501_v57 }
 0x150   :  { %v977_v14 = vadd.f32 %v1503_v11, %v907_v9 }
 0x15e   :  { %v1116_v62 = vpop.f32.mrf.mxu1 }
 0x160   :  { %v1571_v0 = vpop.f32.mrf.mxu1 }
 0x16a   :  { %v1536_v12 = vpop.f32.mrf.mxu0 }
 0x16c   :  { %v1537_v13 = vpop.f32.mrf.mxu0 }
 0x16d   :  { %v1538_v16 = vadd.f32 %v1537_v13, %v1536_v12 }
 0x16f   :  { %v1047_v17 = vadd.f32 %v1538_v16, %v977_v14 }
 0x171   :  { %v1117_v53 = vadd.f32 %v1116_v62, %v1047_v17 }
 0x173   :  { %v1120_v18 = vmax.f32 %v1117_v53, 0.0 }
 0x175   :  { %1581 = vmatmul.mubr.msk.f32.vlgmr.msra.gmra.mxu1 %vm1126_vm2, %v1120_v18 }
 0x235   :  { %v1196_v22 = vpop.f32.mrf.mxu1 }
 0x236   :  { %v1197_v23 = vadd.f32 %v1196_v22, %v1125_v21 }
 0x237   :  { %v1582_v24 = vpop.f32.mrf.mxu1 }
 0x238   :  { %v1203_v25 = vsel %vm1202_vm3, %v1197_v23, -1e+30 }
 0x239   :  { %v1205_v26 = vsel %vm1204_vm4, %v1203_v25, -inf }
 0x23a   :  { %1206 = vmax.xlane.f32.xlu0 %v1205_v26 }
 0x2c3   :  { %v1207_v28 = vpop.xlane.xlu0 %1206 }
 0x2c4   :  { %v1208_v3 = vsub.f32 %v1203_v25, %v1207_v28 }
 0x2c6   :  { %v1209_v29 = vmul.f32 1.442695, %v1208_v3 }
 0x2c8   :  { %1585 = vpow2.f32 %v1209_v29 }
 0x2d5   :  { %v1586_v30 = vpop.eup %1585 }
 0x2d6   :  { %v1211_v35 = vsel %vm1204_vm4, %v1586_v30, 0.0 }
 0x2d7   :  { %1212 = vadd.xlane.f32.xlu0 %v1211_v35 }
 0x360   :  { %v1213_v56 = vpop.xlane.xlu0 %1212 }
 0x361   :  { %1587 = vrcp.f32 %v1213_v56 }
 0x36e   :  { %v1588_v31 = vpop.eup %1587 }
 0x36f   :  { %v1215_v32 = vmul.f32 %v1588_v31, %v1586_v30 }
 0x371   :  { %v1216_v33 = vsel %vm1202_vm3, %v1215_v32, %v1197_v23 }
 0x372   :  { %1217 = vst.msk [vmem:[%s2635_s5] sm:$0x1] %vm1204_vm4, %v1216_v33 }

</bundles_post_ra>
